<compile_context>
chip_gen: v5e
topology: v5e:2x2
jax: 0.10.0
libtpu: 0.0.40
codegen_flags: <defaults>
</compile_context>

<pallas_src>
from typing import NamedTuple, Optional

import jax
import jax.numpy as jnp
from jax.experimental import pallas as pl
from jax.experimental.pallas import tpu as pltpu


def _round_up(x, m):
    return (x + m - 1) // m * m


# ----------------------------------------------------------------------------
# Kernel
# ----------------------------------------------------------------------------
def mlp_kernel(x_ref, w1_ref, b1_ref, w2_ref, b2_ref, o_ref):
    # In-kernel cast of x to the matmul input dtype (bf16 fast path on
    # v6e/v7x); rides the VPU, avoids a standalone HBM read+write pass.
    x = x_ref[...].astype(w1_ref.dtype)
    # First linear on the MXU, f32 accumulation.
    h = jnp.dot(x, w1_ref[...], preferred_element_type=jnp.float32)
    # Bias + ReLU stay f32 on the VPU (fast path on all generations, incl v5e).
    h = jnp.maximum(h + b1_ref[...], 0.0)
    # Second linear; hidden and out columns are lane-padded to 128 multiples,
    # so this dot and the store below are full-tile / unmasked.
    y = jnp.dot(h.astype(w2_ref.dtype), w2_ref[...],
                preferred_element_type=jnp.float32)
    o_ref[...] = (y + b2_ref[...]).astype(o_ref.dtype)


# ----------------------------------------------------------------------------
# One-time parameter preprocessing (hoisted out of the per-call forward path)
# ----------------------------------------------------------------------------
class MLPParams(NamedTuple):
    w1: jax.Array   # [in_dim, hid_pad]  (matmul dtype)
    b1: jax.Array   # [1, hid_pad]       (f32)
    w2: jax.Array   # [hid_pad, out_pad] (matmul dtype)
    b2: jax.Array   # [1, out_pad]       (f32)
    out_dim: int    # real (unpadded) output width


def prepare_params(w1, b1, w2, b2, *, matmul_dtype: Optional[jnp.dtype] = jnp.bfloat16):
    """Pad hidden/out_dim to multiples of 128 (lane-dense), cast weights to the
    MXU input dtype (bf16 default; pass None to keep f32), reshape biases."""
    in_dim, hidden = w1.shape
    out_dim = w2.shape[1]
    hid_pad = _round_up(hidden, 128)
    out_pad = _round_up(out_dim, 128)

    if hid_pad != hidden:
        # Zero-padded hidden units: w1 col = 0, b1 = 0 -> ReLU(0) = 0 -> they
        # contribute nothing through w2, so semantics are preserved.
        w1 = jnp.pad(w1, ((0, 0), (0, hid_pad - hidden)))
        b1 = jnp.pad(b1, ((0, hid_pad - hidden),))
        w2 = jnp.pad(w2, ((0, hid_pad - hidden), (0, 0)))
    if out_pad != out_dim:
        w2 = jnp.pad(w2, ((0, 0), (0, out_pad - out_dim)))
        b2 = jnp.pad(b2, ((0, out_pad - out_dim),))

    if matmul_dtype is not None:
        w1 = w1.astype(matmul_dtype)
        w2 = w2.astype(matmul_dtype)

    b1 = b1.reshape(1, hid_pad).astype(jnp.float32)
    b2 = b2.reshape(1, out_pad).astype(jnp.float32)
    return MLPParams(w1=w1, b1=b1, w2=w2, b2=b2, out_dim=out_dim)


# ----------------------------------------------------------------------------
# Forward wrapper
# ----------------------------------------------------------------------------
_VMEM_BUDGET = 48 * (1 << 20)   # conservative: leaves headroom under v7x's 64 MiB/TC


def simple_mlp_forward(x, params: MLPParams, *, block_b=512):
    """x: [B, in_dim]; params from prepare_params(). Returns [B, out_dim]."""
    B, in_dim = x.shape
    w1, b1, w2, b2 = params.w1, params.b1, params.w2, params.b2
    assert w1.shape[0] == in_dim, "x feature dim does not match w1"
    hid_pad = w1.shape[1]
    out_pad = w2.shape[1]
    out_dtype = x.dtype

    x_sz = jnp.dtype(x.dtype).itemsize
    o_sz = jnp.dtype(out_dtype).itemsize
    w_sz = jnp.dtype(w1.dtype).itemsize

    # Sublane multiple for the batch tile: 16 when the I/O dtype is 16-bit.
    sub = 16 if o_sz == 2 else 8
    # Guard user-supplied block_b (must respect the (8,128)/(16,128) rule).
    block_b = max(sub, _round_up(int(block_b), sub))

    # Conservative VMEM footprint (assumes double-buffered weights, so the
    # fallback path below is always safe; single-buffering only adds headroom).
    def footprint(tb):
        x_bytes = 2 * tb * in_dim * x_sz                       # x tile, double-buffered
        o_bytes = 2 * tb * out_pad * o_sz                      # out tile, double-buffered
        w_bytes = 2 * ((in_dim * hid_pad + hid_pad * out_pad) * w_sz
                       + (hid_pad + out_pad) * 4)              # resident weights/biases
        tmp_bytes = tb * hid_pad * 4 + tb * out_pad * 4        # f32 h / y temporaries
        return x_bytes + o_bytes + w_bytes + tmp_bytes

    # Pick the largest batch tile that fits the budget.
    tb = min(block_b, _round_up(B, sub))
    while tb > sub and footprint(tb) > _VMEM_BUDGET:
        tb = max(sub, _round_up(tb // 2, sub))
    if footprint(tb) > _VMEM_BUDGET:
        # TODO(synk): add a K-reduction grid axis (tile in_dim/hidden with an
        # f32 VMEM accumulator) once the resident weights no longer fit VMEM.
        raise ValueError("weights too large for the resident-weight MLP kernel")

    # Ensure >=2 grid steps when B allows, so v7x's second TensorCore gets work.
    if B >= 2 * sub:
        tb = min(tb, _round_up((B + 1) // 2, sub))

    b_pad = _round_up(B, tb)
    if b_pad != B:
        x = jnp.pad(x, ((0, b_pad - B), (0, 0)))
    grid = (b_pad // tb,)

    # Explicit scoped-VMEM limit derived from the real footprint (defaults are
    # only 16 MiB on v5e / 32 MiB on v6e, v7x).
    vmem_limit = int(min(60 * (1 << 20),
                         max(footprint(tb) * 5 // 4, 32 * (1 << 20))))

    flops = 2 * b_pad * (in_dim * hid_pad + hid_pad * out_pad)
    bytes_accessed = (b_pad * in_dim * x_sz
                      + (in_dim * hid_pad + hid_pad * out_pad) * w_sz
                      + (hid_pad + out_pad) * 4
                      + b_pad * out_pad * o_sz)

    vmem = pltpu.MemorySpace.VMEM

    def build(single_buffer_weights):
        # Weights/biases have a constant index_map (resident in VMEM); request
        # a single buffer for them to halve their VMEM footprint.
        wkw = dict(pipeline_mode=pl.Buffered(1)) if single_buffer_weights else {}
        in_specs = [
            # x: one batch tile per grid step (double-buffered by Pallas).
            pl.BlockSpec((tb, in_dim), lambda i: (i, 0), memory_space=vmem),
            pl.BlockSpec((in_dim, hid_pad), lambda i: (0, 0), memory_space=vmem, **wkw),
            pl.BlockSpec((1, hid_pad), lambda i: (0, 0), memory_space=vmem, **wkw),
            pl.BlockSpec((hid_pad, out_pad), lambda i: (0, 0), memory_space=vmem, **wkw),
            pl.BlockSpec((1, out_pad), lambda i: (0, 0), memory_space=vmem, **wkw),
        ]
        return pl.pallas_call(
            mlp_kernel,
            out_shape=jax.ShapeDtypeStruct((b_pad, out_pad), out_dtype),
            grid=grid,
            in_specs=in_specs,
            out_specs=pl.BlockSpec((tb, out_pad), lambda i: (i, 0),
                                   memory_space=vmem),
            compiler_params=pltpu.CompilerParams(
                dimension_semantics=("parallel",),
                vmem_limit_bytes=vmem_limit),
            cost_estimate=pl.CostEstimate(
                flops=flops, transcendentals=0, bytes_accessed=bytes_accessed),
        )

    try:
        out = build(True)(x, w1, b1, w2, b2)
    except Exception:
        # Fallback for jax versions without BlockSpec pipeline_mode support:
        # default double-buffered weights (already covered by the VMEM budget).
        out = build(False)(x, w1, b1, w2, b2)

    # Strip batch and lane padding.
    return out[:B, :params.out_dim]


# ----------------------------------------------------------------------------
# Init (mimics nn.Linear's uniform(-1/sqrt(fan_in), 1/sqrt(fan_in)))
# ----------------------------------------------------------------------------
def init_params(key, in_dim, out_dim, hidden_dim=128):
    k1, k2, k3, k4 = jax.random.split(key, 4)
    bound1 = 1.0 / jnp.sqrt(in_dim)
    bound2 = 1.0 / jnp.sqrt(hidden_dim)
    # PyTorch stores weight as [out, in]; we pre-transpose to [in, out].
    w1 = jax.random.uniform(k1, (in_dim, hidden_dim), jnp.float32, -bound1, bound1)
    b1 = jax.random.uniform(k2, (hidden_dim,), jnp.float32, -bound1, bound1)
    w2 = jax.random.uniform(k3, (hidden_dim, out_dim), jnp.float32, -bound2, bound2)
    b2 = jax.random.uniform(k4, (out_dim,), jnp.float32, -bound2, bound2)
    return w1, b1, w2, b2


if __name__ == "__main__":
    # use_normalization=False branch (default) — no DynamicNorm needed.
    B, in_dim, hidden_dim, out_dim = 8, 32, 128, 16

    key = jax.random.PRNGKey(0)
    kx, kp = jax.random.split(key)
    x = jax.random.normal(kx, (B, in_dim), jnp.float32)
    w1, b1, w2, b2 = init_params(kp, in_dim, out_dim, hidden_dim)

    # Pure-JAX reference of the forward semantics.
    ref = jnp.maximum(x @ w1 + b1, 0.0) @ w2 + b2

    # f32 weight path: tight check.
    params_f32 = prepare_params(w1, b1, w2, b2, matmul_dtype=None)
    out_f32 = jax.block_until_ready(simple_mlp_forward(x, params_f32))
    assert out_f32.shape == (B, out_dim)
    assert jnp.allclose(out_f32, ref, atol=1e-5, rtol=1e-5)

    # bf16 dot-input path (default; v6e/v7x MXU fast path, f32 accumulate).
    params_bf16 = prepare_params(w1, b1, w2, b2)   # bf16 by default
    out_bf16 = jax.block_until_ready(simple_mlp_forward(x, params_bf16))
    assert out_bf16.shape == (B, out_dim)
    assert jnp.allclose(out_bf16, ref, atol=2e-2, rtol=2e-2)

    print("KERNEL_OK")
</pallas_src>

<mosaic_0001>
module attributes {stable_mosaic.version = 11 : i64} {
  func.func @mlp_kernel(%arg0: i32, %arg1: memref<8x32xf32, #tpu.memory_space<vmem>>, %arg2: memref<32x128xf32, #tpu.memory_space<vmem>>, %arg3: memref<1x128xf32, #tpu.memory_space<vmem>>, %arg4: memref<128x128xf32, #tpu.memory_space<vmem>>, %arg5: memref<1x128xf32, #tpu.memory_space<vmem>>, %arg6: memref<8x128xf32, #tpu.memory_space<vmem>>) attributes {dimension_semantics = [#tpu.dimension_semantics<parallel>], iteration_bounds = array<i64: 1>, scalar_prefetch = 0 : i64, scratch_operands = 0 : i64, tpu.core_type = #tpu.core_type<tc>, window_params = [{transform_indices = @transform_0, window_bounds = array<i64: 8, 32>}, {pipeline_mode = #tpu.pipeline_mode<synchronous>, transform_indices = @transform_1, window_bounds = array<i64: 32, 128>}, {pipeline_mode = #tpu.pipeline_mode<synchronous>, transform_indices = @transform_2, window_bounds = array<i64: 1, 128>}, {pipeline_mode = #tpu.pipeline_mode<synchronous>, transform_indices = @transform_3, window_bounds = array<i64: 128, 128>}, {pipeline_mode = #tpu.pipeline_mode<synchronous>, transform_indices = @transform_4, window_bounds = array<i64: 1, 128>}, {transform_indices = @transform_5, window_bounds = array<i64: 8, 128>}]} {
    %c0 = arith.constant 0 : index
    %c0_0 = arith.constant 0 : index
    %0 = vector.load %arg1[%c0, %c0_0] : memref<8x32xf32, #tpu.memory_space<vmem>>, vector<8x32xf32>
    %c0_1 = arith.constant 0 : index
    %c0_2 = arith.constant 0 : index
    %1 = vector.load %arg2[%c0_1, %c0_2] : memref<32x128xf32, #tpu.memory_space<vmem>>, vector<32x128xf32>
    %cst = arith.constant dense<0.000000e+00> : vector<8x128xf32>
    %2 = tpu.matmul %0, %1, %cst {dimension_numbers = #tpu.dot_dimension_numbers<[1], [0], [0], [1], [0, 0, 1, 1], [], []>} : vector<8x32xf32>, vector<32x128xf32>, vector<8x128xf32> -> vector<8x128xf32>
    %c0_3 = arith.constant 0 : index
    %c0_4 = arith.constant 0 : index
    %3 = vector.load %arg3[%c0_3, %c0_4] : memref<1x128xf32, #tpu.memory_space<vmem>>, vector<1x128xf32>
    %4 = vector.broadcast %3 : vector<1x128xf32> to vector<8x128xf32>
    %5 = arith.addf %2, %4 : vector<8x128xf32>
    %cst_5 = arith.constant 0.000000e+00 : f32
    %6 = vector.broadcast %cst_5 : f32 to vector<8x128xf32>
    %7 = arith.maximumf %5, %6 : vector<8x128xf32>
    %c0_6 = arith.constant 0 : index
    %c0_7 = arith.constant 0 : index
    %8 = vector.load %arg4[%c0_6, %c0_7] : memref<128x128xf32, #tpu.memory_space<vmem>>, vector<128x128xf32>
    %cst_8 = arith.constant dense<0.000000e+00> : vector<8x128xf32>
    %9 = tpu.matmul %7, %8, %cst_8 {dimension_numbers = #tpu.dot_dimension_numbers<[1], [0], [0], [1], [0, 0, 1, 1], [], []>} : vector<8x128xf32>, vector<128x128xf32>, vector<8x128xf32> -> vector<8x128xf32>
    %c0_9 = arith.constant 0 : index
    %c0_10 = arith.constant 0 : index
    %10 = vector.load %arg5[%c0_9, %c0_10] : memref<1x128xf32, #tpu.memory_space<vmem>>, vector<1x128xf32>
    %11 = vector.broadcast %10 : vector<1x128xf32> to vector<8x128xf32>
    %12 = arith.addf %9, %11 : vector<8x128xf32>
    %c0_11 = arith.constant 0 : index
    %c0_12 = arith.constant 0 : index
    %13 = vector.load %arg6[%c0_11, %c0_12] : memref<8x128xf32, #tpu.memory_space<vmem>>, vector<8x128xf32>
    tpu.vector_store %arg6[%c0_11, %c0_12], %12 {strides = array<i32>} : memref<8x128xf32, #tpu.memory_space<vmem>>, vector<8x128xf32>,
    return
  }
  func.func @transform_0(%arg0: i32) -> (i32, i32) {
    %c0_i32 = arith.constant 0 : i32
    %c0_i32_0 = arith.constant 0 : i32
    return %arg0, %c0_i32 : i32, i32
  }
  func.func @transform_1(%arg0: i32) -> (i32, i32) {
    %c0_i32 = arith.constant 0 : i32
    %c0_i32_0 = arith.constant 0 : i32
    %c0_i32_1 = arith.constant 0 : i32
    return %c0_i32, %c0_i32_0 : i32, i32
  }
  func.func @transform_2(%arg0: i32) -> (i32, i32) {
    %c0_i32 = arith.constant 0 : i32
    %c0_i32_0 = arith.constant 0 : i32
    %c0_i32_1 = arith.constant 0 : i32
    return %c0_i32, %c0_i32_0 : i32, i32
  }
  func.func @transform_3(%arg0: i32) -> (i32, i32) {
    %c0_i32 = arith.constant 0 : i32
    %c0_i32_0 = arith.constant 0 : i32
    %c0_i32_1 = arith.constant 0 : i32
    return %c0_i32, %c0_i32_0 : i32, i32
  }
  func.func @transform_4(%arg0: i32) -> (i32, i32) {
    %c0_i32 = arith.constant 0 : i32
    %c0_i32_0 = arith.constant 0 : i32
    %c0_i32_1 = arith.constant 0 : i32
    return %c0_i32, %c0_i32_0 : i32, i32
  }
  func.func @transform_5(%arg0: i32) -> (i32, i32) {
    %c0_i32 = arith.constant 0 : i32
    %c0_i32_0 = arith.constant 0 : i32
    return %arg0, %c0_i32 : i32, i32
  }
}

module attributes {stable_mosaic.version = 11 : i64} {
  func.func @mlp_kernel(%arg0: i32, %arg1: memref<8x32xf32, #tpu.memory_space<vmem>>, %arg2: memref<32x128xf32, #tpu.memory_space<vmem>>, %arg3: memref<1x128xf32, #tpu.memory_space<vmem>>, %arg4: memref<128x128xf32, #tpu.memory_space<vmem>>, %arg5: memref<1x128xf32, #tpu.memory_space<vmem>>, %arg6: memref<8x128xf32, #tpu.memory_space<vmem>>) attributes {dimension_semantics = [#tpu.dimension_semantics<parallel>], iteration_bounds = array<i64: 1>, scalar_prefetch = 0 : i64, scratch_operands = 0 : i64, tpu.core_type = #tpu.core_type<tc>, window_params = [{transform_indices = @transform_0, window_bounds = array<i64: 8, 32>}, {pipeline_mode = #tpu.pipeline_mode<synchronous>, transform_indices = @transform_1, window_bounds = array<i64: 32, 128>}, {pipeline_mode = #tpu.pipeline_mode<synchronous>, transform_indices = @transform_2, window_bounds = array<i64: 1, 128>}, {pipeline_mode = #tpu.pipeline_mode<synchronous>, transform_indices = @transform_3, window_bounds = array<i64: 128, 128>}, {pipeline_mode = #tpu.pipeline_mode<synchronous>, transform_indices = @transform_4, window_bounds = array<i64: 1, 128>}, {transform_indices = @transform_5, window_bounds = array<i64: 8, 128>}]} {
    %c0 = arith.constant 0 : index
    %c0_0 = arith.constant 0 : index
    %0 = vector.load %arg1[%c0, %c0_0] : memref<8x32xf32, #tpu.memory_space<vmem>>, vector<8x32xf32>
    %c0_1 = arith.constant 0 : index
    %c0_2 = arith.constant 0 : index
    %1 = vector.load %arg2[%c0_1, %c0_2] : memref<32x128xf32, #tpu.memory_space<vmem>>, vector<32x128xf32>
    %cst = arith.constant dense<0.000000e+00> : vector<8x128xf32>
    %2 = tpu.matmul %0, %1, %cst {dimension_numbers = #tpu.dot_dimension_numbers<[1], [0], [0], [1], [0, 0, 1, 1], [], []>} : vector<8x32xf32>, vector<32x128xf32>, vector<8x128xf32> -> vector<8x128xf32>
    %c0_3 = arith.constant 0 : index
    %c0_4 = arith.constant 0 : index
    %3 = vector.load %arg3[%c0_3, %c0_4] : memref<1x128xf32, #tpu.memory_space<vmem>>, vector<1x128xf32>
    %4 = vector.broadcast %3 : vector<1x128xf32> to vector<8x128xf32>
    %5 = arith.addf %2, %4 : vector<8x128xf32>
    %cst_5 = arith.constant 0.000000e+00 : f32
    %6 = vector.broadcast %cst_5 : f32 to vector<8x128xf32>
    %7 = arith.maximumf %5, %6 : vector<8x128xf32>
    %c0_6 = arith.constant 0 : index
    %c0_7 = arith.constant 0 : index
    %8 = vector.load %arg4[%c0_6, %c0_7] : memref<128x128xf32, #tpu.memory_space<vmem>>, vector<128x128xf32>
    %cst_8 = arith.constant dense<0.000000e+00> : vector<8x128xf32>
    %9 = tpu.matmul %7, %8, %cst_8 {dimension_numbers = #tpu.dot_dimension_numbers<[1], [0], [0], [1], [0, 0, 1, 1], [], []>} : vector<8x128xf32>, vector<128x128xf32>, vector<8x128xf32> -> vector<8x128xf32>
    %c0_9 = arith.constant 0 : index
    %c0_10 = arith.constant 0 : index
    %10 = vector.load %arg5[%c0_9, %c0_10] : memref<1x128xf32, #tpu.memory_space<vmem>>, vector<1x128xf32>
    %11 = vector.broadcast %10 : vector<1x128xf32> to vector<8x128xf32>
    %12 = arith.addf %9, %11 : vector<8x128xf32>
    %c0_11 = arith.constant 0 : index
    %c0_12 = arith.constant 0 : index
    %13 = vector.load %arg6[%c0_11, %c0_12] : memref<8x128xf32, #tpu.memory_space<vmem>>, vector<8x128xf32>
    tpu.vector_store %arg6[%c0_11, %c0_12], %12 {strides = array<i32>} : memref<8x128xf32, #tpu.memory_space<vmem>>, vector<8x128xf32>,
    return
  }
  func.func @transform_0(%arg0: i32) -> (i32, i32) {
    %c0_i32 = arith.constant 0 : i32
    %c0_i32_0 = arith.constant 0 : i32
    return %arg0, %c0_i32 : i32, i32
  }
  func.func @transform_1(%arg0: i32) -> (i32, i32) {
    %c0_i32 = arith.constant 0 : i32
    %c0_i32_0 = arith.constant 0 : i32
    %c0_i32_1 = arith.constant 0 : i32
    return %c0_i32, %c0_i32_0 : i32, i32
  }
  func.func @transform_2(%arg0: i32) -> (i32, i32) {
    %c0_i32 = arith.constant 0 : i32
    %c0_i32_0 = arith.constant 0 : i32
    %c0_i32_1 = arith.constant 0 : i32
    return %c0_i32, %c0_i32_0 : i32, i32
  }
  func.func @transform_3(%arg0: i32) -> (i32, i32) {
    %c0_i32 = arith.constant 0 : i32
    %c0_i32_0 = arith.constant 0 : i32
    %c0_i32_1 = arith.constant 0 : i32
    return %c0_i32, %c0_i32_0 : i32, i32
  }
  func.func @transform_4(%arg0: i32) -> (i32, i32) {
    %c0_i32 = arith.constant 0 : i32
    %c0_i32_0 = arith.constant 0 : i32
    %c0_i32_1 = arith.constant 0 : i32
    return %c0_i32, %c0_i32_0 : i32, i32
  }
  func.func @transform_5(%arg0: i32) -> (i32, i32) {
    %c0_i32 = arith.constant 0 : i32
    %c0_i32_0 = arith.constant 0 : i32
    return %arg0, %c0_i32 : i32, i32
  }
}

</mosaic_0001>

<bundles_post_ra>
// kernel: tpu_custom_call.1
= control target key start
LH: loop header
LB: loop body
LE: loop exit
PB: predicated region body
PF: predicated region fallthrough
CT: control target
= control target key end

     0   :  { %10 = vsyncpa [#allocation3], 0  ;;  %s324_s0 = inlined_call_operand.hbm [shape: f32[8,32], index: 0, kind: input, shape index: {}]   ;;  %s325_s1 = inlined_call_operand.hbm [shape: f32[32,128], index: 1, kind: input, shape index: {}]   ;;  %s326_s2 = inlined_call_operand.vmem [shape: f32[1,128], index: 2, kind: input, shape index: {}]   ;;  %s327_s3 = inlined_call_operand.hbm [shape: f32[128,128], index: 3, kind: input, shape index: {}]   ;;  %s328_s4 = inlined_call_operand.vmem [shape: f32[1,128], index: 4, kind: input, shape index: {}]   ;;  %s329_s5 = inlined_call_operand.hbm [shape: f32[8,128], index: 5, kind: output, shape index: {}]  }
   0x1   :  { %11 = vsyncpa [#allocation6], 0  ;;  %s28_s20 = sshll.u32 %s325_s1, 4  ;;  %s29_s20 = int_to_ptr.hbm [resolvable:$true] %s28_s20 }
   0x2   :  { %12 = vsyncpa [#allocation4], 0  ;;  %s270_s21 = smov [#allocation5]   ;;  %s18_s25 = sshll.u32 %s324_s0, 4  ;;  %s19_s25 = int_to_ptr.hbm [resolvable:$true] %s18_s25 }
   0x3   :  { %s30_s22 = sshll.u32 %s270_s21, 4  ;;  %s271_s26 = smov 128   ;;  %s31_s22 = int_to_ptr.vmem [resolvable:$true] %s30_s22 }
   0x4   :  { %s272_s27 = smov 8   ;;  %s273_s28 = smov [#allocation2]  }
   0x5   :  { %36 = dma.hbm_to_vmem [thread:$0]  %s29_s20, 512, %s31_s22, [#allocation6], %s271_s26, %s271_s26, %s272_s27  }
   0x6   :  { %s20_s29 = sshll.u32 %s273_s28, 4  ;;  %s43_s7 = sshll.u32 %s327_s3, 4  ;;  %s21_s29 = int_to_ptr.vmem [resolvable:$true] %s20_s29  ;;  %s44_s7 = int_to_ptr.hbm [resolvable:$true] %s43_s7 }
   0x7   :  { %23 = dma.hbm_to_vmem [thread:$0]  %s19_s25, 128, %s21_s29, [#allocation3]  }
   0x8   :  { %s274_s1 = smov [#allocation7]  }
   0x9   :  { %s45_s8 = sshll.u32 %s274_s1, 4  ;;  %s46_s8 = int_to_ptr.vmem [resolvable:$true] %s45_s8 }
   0xa   :  { %51 = dma.hbm_to_vmem [thread:$0]  %s44_s7, 2048, %s46_s8, [#allocation6], %s271_s26, %s271_s26, %s272_s27  }
   0xb   :  { %264 = dma.done.wait [#allocation3], 128  }
   0xc   :  { %265 = vsyncadd [#allocation3], 4294967168 }
   0xd   :  { %266 = dma.done.wait [#allocation6], 2560  }
   0xe   :  { %267 = vsyncadd [#allocation6], 4294964736  ;;  %v70_v0 = vld [vmem:[#allocation5 + $0x18] sm:$0xff]  ;;  %v69_v1 = vld [vmem:[#allocation5 + $0x10] sm:$0xff]  ;;  %vm75_vm0 = vcmask 261120   ;;  %s275_s11 = smov [#allocation8]  }
   0xf   :  { %91 = vmatpush.msra.mxu0 %v70_v0  ;;  %v115_v2 = vld [vmem:[#allocation7 + $0x78] sm:$0xff]  ;;  %v68_v3 = vld [vmem:[#allocation5 + $0x8] sm:$0xff]  ;;  %v114_v4 = vld [vmem:[#allocation7 + $0x70] sm:$0xff]  ;;  %s146_s12 = sshll.u32 %s275_s11, 4  ;;  %s148_s15 = sshll.u32 %s329_s5, 4  ;;  %s147_s12 = int_to_ptr.vmem [resolvable:$true] %s146_s12  ;;  %s149_s15 = int_to_ptr.hbm [resolvable:$true] %s148_s15 }
  0x10   :  { %120 = vmatpush.msra.mxu1 %v115_v2  ;;  %v113_v5 = vld [vmem:[#allocation7 + $0x68] sm:$0xff]  ;;  %v67_v6 = vld [vmem:[#allocation5] sm:$0xff]  ;;  %v66_v7 = vld [vmem:[#allocation2] sm:$0xff] }
  0x11   :  { %92 = vmatpush.msra.mxu0 %v69_v1  ;;  %v112_v8 = vld [vmem:[#allocation7 + $0x60] sm:$0xff]  ;;  %v111_v9 = vld [vmem:[#allocation7 + $0x58] sm:$0xff]  ;;  %v110_v10 = vld [vmem:[#allocation7 + $0x50] sm:$0xff] }
  0x12   :  { %121 = vmatpush.msra.mxu1 %v114_v4  ;;  %v109_v11 = vld [vmem:[#allocation7 + $0x48] sm:$0xff]  ;;  %v108_v12 = vld [vmem:[#allocation7 + $0x40] sm:$0xff]  ;;  %v107_v13 = vld [vmem:[#allocation7 + $0x38] sm:$0xff] }
  0x13   :  { %93 = vmatpush.msra.mxu0 %v68_v3  ;;  %v106_v14 = vld [vmem:[#allocation7 + $0x30] sm:$0xff]  ;;  %v105_v15 = vld [vmem:[#allocation7 + $0x28] sm:$0xff]  ;;  %v104_v16 = vld [vmem:[#allocation7 + $0x20] sm:$0xff] }
  0x14   :  { %122 = vmatpush.msra.mxu1 %v113_v5  ;;  %v103_v17 = vld [vmem:[#allocation7 + $0x18] sm:$0xff]  ;;  %v102_v18 = vld [vmem:[#allocation7 + $0x10] sm:$0xff]  ;;  %v101_v19 = vld [vmem:[#allocation7 + $0x8] sm:$0xff] }
  0x15   :  { %94 = vmatpush.msra.mxu0 %v67_v6  ;;  %v100_v20 = vld [vmem:[#allocation7] sm:$0xff]  ;;  %v166_v21 = vld [vmem:[%s326_s2] ss:$0 sm:$0xff] }
  0x16   :  { %159 = vmatmul.msk.f32.vlgmr.msra.gmra.mxu0 %vm75_vm0, %v66_v7  ;;  %123 = vmatpush.msra.mxu1 %v112_v8  ;;  %v167_v25 = vld [vmem:[%s328_s4] ss:$0 sm:$0xff] }
  0x18   :  { %124 = vmatpush.msra.mxu1 %v111_v9 }
  0x1a   :  { %125 = vmatpush.msra.mxu1 %v110_v10 }
  0x1c   :  { %126 = vmatpush.msra.mxu1 %v109_v11 }
  0x1e   :  { %127 = vmatpush.msra.mxu1 %v108_v12 }
  0x20   :  { %128 = vmatpush.msra.mxu1 %v107_v13 }
  0x22   :  { %129 = vmatpush.msra.mxu1 %v106_v14 }
  0x24   :  { %130 = vmatpush.msra.mxu1 %v105_v15 }
  0x26   :  { %131 = vmatpush.msra.mxu1 %v104_v16 }
  0x28   :  { %132 = vmatpush.msra.mxu1 %v103_v17 }
  0x2a   :  { %133 = vmatpush.msra.mxu1 %v102_v18 }
  0x2c   :  { %134 = vmatpush.msra.mxu1 %v101_v19 }
  0x2e   :  { %135 = vmatpush.msra.mxu1 %v100_v20 }
  0x93   :  { %v96_v22 = vpop.f32.mrf.mxu0 }
  0x94   :  { %v97_v23 = vadd.f32 %v166_v21, %v96_v22 }
  0x96   :  { %v99_v24 = vmax.f32 %v97_v23, 0.0 }
  0x98   :  { %136 = vmatmul.f32.vlgmr.msra.gmra.mxu1 %v99_v24 }
 0x115   :  { %v137_v26 = vpop.f32.mrf.mxu1 }
 0x116   :  { %v138_v27 = vadd.f32 %v167_v25, %v137_v26 }
 0x118   :  { %140 = vst [vmem:[#allocation8] sm:$0xff] %v138_v27 }
 0x119   :  { %151 = dma.vmem_to_hbm [thread:$0]  %s147_s12, 128, %s149_s15, [#allocation4]  }
 0x11a   :  { %268 = dma.done.wait [#allocation4], 128  }
 0x11b   :  { %269 = vsyncadd [#allocation4], 4294967168 }
 0x11c   :  { %156 = vsyncpa [#allocation3], 1 }
 0x11d   :  { %157 = vsyncpa [#allocation6], 1 }
 0x11e   :  { %158 = vsyncpa [#allocation4], 1 }

// kernel: tpu_custom_call.1
= control target key start
LH: loop header
LB: loop body
LE: loop exit
PB: predicated region body
PF: predicated region fallthrough
CT: control target
= control target key end

     0   :  { %10 = vsyncpa [#allocation3], 0  ;;  %s324_s0 = inlined_call_operand.hbm [shape: f32[8,32], index: 0, kind: input, shape index: {}]   ;;  %s325_s1 = inlined_call_operand.hbm [shape: f32[32,128], index: 1, kind: input, shape index: {}]   ;;  %s326_s2 = inlined_call_operand.vmem [shape: f32[1,128], index: 2, kind: input, shape index: {}]   ;;  %s327_s3 = inlined_call_operand.hbm [shape: f32[128,128], index: 3, kind: input, shape index: {}]   ;;  %s328_s4 = inlined_call_operand.vmem [shape: f32[1,128], index: 4, kind: input, shape index: {}]   ;;  %s329_s5 = inlined_call_operand.hbm [shape: f32[8,128], index: 5, kind: output, shape index: {}]  }
   0x1   :  { %11 = vsyncpa [#allocation6], 0  ;;  %s28_s20 = sshll.u32 %s325_s1, 4  ;;  %s29_s20 = int_to_ptr.hbm [resolvable:$true] %s28_s20 }
   0x2   :  { %12 = vsyncpa [#allocation4], 0  ;;  %s270_s21 = smov [#allocation5]   ;;  %s18_s25 = sshll.u32 %s324_s0, 4  ;;  %s19_s25 = int_to_ptr.hbm [resolvable:$true] %s18_s25 }
   0x3   :  { %s30_s22 = sshll.u32 %s270_s21, 4  ;;  %s271_s26 = smov 128   ;;  %s31_s22 = int_to_ptr.vmem [resolvable:$true] %s30_s22 }
   0x4   :  { %s272_s27 = smov 8   ;;  %s273_s28 = smov [#allocation2]  }
   0x5   :  { %36 = dma.hbm_to_vmem [thread:$0]  %s29_s20, 512, %s31_s22, [#allocation6], %s271_s26, %s271_s26, %s272_s27  }
   0x6   :  { %s20_s29 = sshll.u32 %s273_s28, 4  ;;  %s43_s7 = sshll.u32 %s327_s3, 4  ;;  %s21_s29 = int_to_ptr.vmem [resolvable:$true] %s20_s29  ;;  %s44_s7 = int_to_ptr.hbm [resolvable:$true] %s43_s7 }
   0x7   :  { %23 = dma.hbm_to_vmem [thread:$0]  %s19_s25, 128, %s21_s29, [#allocation3]  }
   0x8   :  { %s274_s1 = smov [#allocation7]  }
   0x9   :  { %s45_s8 = sshll.u32 %s274_s1, 4  ;;  %s46_s8 = int_to_ptr.vmem [resolvable:$true] %s45_s8 }
   0xa   :  { %51 = dma.hbm_to_vmem [thread:$0]  %s44_s7, 2048, %s46_s8, [#allocation6], %s271_s26, %s271_s26, %s272_s27  }
   0xb   :  { %264 = dma.done.wait [#allocation3], 128  }
   0xc   :  { %265 = vsyncadd [#allocation3], 4294967168 }
   0xd   :  { %266 = dma.done.wait [#allocation6], 2560  }
   0xe   :  { %267 = vsyncadd [#allocation6], 4294964736  ;;  %v70_v0 = vld [vmem:[#allocation5 + $0x18] sm:$0xff]  ;;  %v69_v1 = vld [vmem:[#allocation5 + $0x10] sm:$0xff]  ;;  %vm75_vm0 = vcmask 261120   ;;  %s275_s11 = smov [#allocation8]  }
   0xf   :  { %91 = vmatpush.msra.mxu0 %v70_v0  ;;  %v115_v2 = vld [vmem:[#allocation7 + $0x78] sm:$0xff]  ;;  %v68_v3 = vld [vmem:[#allocation5 + $0x8] sm:$0xff]  ;;  %v114_v4 = vld [vmem:[#allocation7 + $0x70] sm:$0xff]  ;;  %s146_s12 = sshll.u32 %s275_s11, 4  ;;  %s148_s15 = sshll.u32 %s329_s5, 4  ;;  %s147_s12 = int_to_ptr.vmem [resolvable:$true] %s146_s12  ;;  %s149_s15 = int_to_ptr.hbm [resolvable:$true] %s148_s15 }
  0x10   :  { %120 = vmatpush.msra.mxu1 %v115_v2  ;;  %v113_v5 = vld [vmem:[#allocation7 + $0x68] sm:$0xff]  ;;  %v67_v6 = vld [vmem:[#allocation5] sm:$0xff]  ;;  %v66_v7 = vld [vmem:[#allocation2] sm:$0xff] }
  0x11   :  { %92 = vmatpush.msra.mxu0 %v69_v1  ;;  %v112_v8 = vld [vmem:[#allocation7 + $0x60] sm:$0xff]  ;;  %v111_v9 = vld [vmem:[#allocation7 + $0x58] sm:$0xff]  ;;  %v110_v10 = vld [vmem:[#allocation7 + $0x50] sm:$0xff] }
  0x12   :  { %121 = vmatpush.msra.mxu1 %v114_v4  ;;  %v109_v11 = vld [vmem:[#allocation7 + $0x48] sm:$0xff]  ;;  %v108_v12 = vld [vmem:[#allocation7 + $0x40] sm:$0xff]  ;;  %v107_v13 = vld [vmem:[#allocation7 + $0x38] sm:$0xff] }
  0x13   :  { %93 = vmatpush.msra.mxu0 %v68_v3  ;;  %v106_v14 = vld [vmem:[#allocation7 + $0x30] sm:$0xff]  ;;  %v105_v15 = vld [vmem:[#allocation7 + $0x28] sm:$0xff]  ;;  %v104_v16 = vld [vmem:[#allocation7 + $0x20] sm:$0xff] }
  0x14   :  { %122 = vmatpush.msra.mxu1 %v113_v5  ;;  %v103_v17 = vld [vmem:[#allocation7 + $0x18] sm:$0xff]  ;;  %v102_v18 = vld [vmem:[#allocation7 + $0x10] sm:$0xff]  ;;  %v101_v19 = vld [vmem:[#allocation7 + $0x8] sm:$0xff] }
  0x15   :  { %94 = vmatpush.msra.mxu0 %v67_v6  ;;  %v100_v20 = vld [vmem:[#allocation7] sm:$0xff]  ;;  %v166_v21 = vld [vmem:[%s326_s2] ss:$0 sm:$0xff] }
  0x16   :  { %159 = vmatmul.msk.f32.vlgmr.msra.gmra.mxu0 %vm75_vm0, %v66_v7  ;;  %123 = vmatpush.msra.mxu1 %v112_v8  ;;  %v167_v25 = vld [vmem:[%s328_s4] ss:$0 sm:$0xff] }
  0x18   :  { %124 = vmatpush.msra.mxu1 %v111_v9 }
  0x1a   :  { %125 = vmatpush.msra.mxu1 %v110_v10 }
  0x1c   :  { %126 = vmatpush.msra.mxu1 %v109_v11 }
  0x1e   :  { %127 = vmatpush.msra.mxu1 %v108_v12 }
  0x20   :  { %128 = vmatpush.msra.mxu1 %v107_v13 }
  0x22   :  { %129 = vmatpush.msra.mxu1 %v106_v14 }
  0x24   :  { %130 = vmatpush.msra.mxu1 %v105_v15 }
  0x26   :  { %131 = vmatpush.msra.mxu1 %v104_v16 }
  0x28   :  { %132 = vmatpush.msra.mxu1 %v103_v17 }
  0x2a   :  { %133 = vmatpush.msra.mxu1 %v102_v18 }
  0x2c   :  { %134 = vmatpush.msra.mxu1 %v101_v19 }
  0x2e   :  { %135 = vmatpush.msra.mxu1 %v100_v20 }
  0x93   :  { %v96_v22 = vpop.f32.mrf.mxu0 }
  0x94   :  { %v97_v23 = vadd.f32 %v166_v21, %v96_v22 }
  0x96   :  { %v99_v24 = vmax.f32 %v97_v23, 0.0 }
  0x98   :  { %136 = vmatmul.f32.vlgmr.msra.gmra.mxu1 %v99_v24 }
 0x115   :  { %v137_v26 = vpop.f32.mrf.mxu1 }
 0x116   :  { %v138_v27 = vadd.f32 %v167_v25, %v137_v26 }
 0x118   :  { %140 = vst [vmem:[#allocation8] sm:$0xff] %v138_v27 }
 0x119   :  { %151 = dma.vmem_to_hbm [thread:$0]  %s147_s12, 128, %s149_s15, [#allocation4]  }
 0x11a   :  { %268 = dma.done.wait [#allocation4], 128  }
 0x11b   :  { %269 = vsyncadd [#allocation4], 4294967168 }
 0x11c   :  { %156 = vsyncpa [#allocation3], 1 }
 0x11d   :  { %157 = vsyncpa [#allocation6], 1 }
 0x11e   :  { %158 = vsyncpa [#allocation4], 1 }

</bundles_post_ra>
